<compile_context>
chip_gen: v7x
topology: tpu7x:2x2x1
jax: 0.10.0
libtpu: 0.0.40
codegen_flags: <defaults>
</compile_context>

<pallas_src>
import numpy as np
import jax
import jax.numpy as jnp
from jax.experimental import pallas as pl
from jax.experimental.pallas import tpu as pltpu


def _hann_window(win_length):
    # torch.hann_window default: periodic=True
    n = np.arange(win_length, dtype=np.float64)
    return 0.5 * (1.0 - np.cos(2.0 * np.pi * n / win_length))


def _fused_synthesis_matrix(n_fft, hop, win_length, T, L, L_pad):
    """(2*T*F, L_pad) matrix folding window * inverse-rfft * overlap-add * 1/env."""
    F = n_fft // 2 + 1

    # window, padded to n_fft the same way torch.istft does (centered)
    win = _hann_window(win_length)
    lpad = (n_fft - win_length) // 2
    w = np.zeros((n_fft,), np.float64)
    w[lpad:lpad + win_length] = win

    # inverse real-DFT basis (onesided): frame = Re @ Cw + Im @ Sw
    k = np.arange(F, dtype=np.float64)[:, None]
    n = np.arange(n_fft, dtype=np.float64)[None, :]
    ang = 2.0 * np.pi * k * n / n_fft
    coef = np.full((F, 1), 2.0 / n_fft)
    coef[0, 0] = 1.0 / n_fft
    if n_fft % 2 == 0:
        coef[-1, 0] = 1.0 / n_fft
    Cw = coef * np.cos(ang) * w[None, :]      # (F, n_fft), windowed cos basis
    Sw = -coef * np.sin(ang) * w[None, :]     # (F, n_fft), windowed -sin basis

    # overlap-added squared-window envelope and its (guarded) reciprocal
    env = np.zeros((L,), np.float64)
    for t in range(T):
        env[t * hop:t * hop + n_fft] += w * w
    # TODO(synk): torch.istft raises a NOLA RuntimeError where the window
    # envelope is ~0 (e.g. sample 0 for a periodic Hann with center=False);
    # here those samples are emitted as 0 instead of erroring.
    inv_env = np.where(env > 1e-11, 1.0 / env, 0.0)

    # scatter the bases to their overlap-add positions, scale columns by 1/env
    M = np.zeros((2, T, F, L_pad), np.float64)
    for t in range(T):
        s = t * hop
        M[0, t, :, s:s + n_fft] += Cw
        M[1, t, :, s:s + n_fft] += Sw
    M[..., :L] *= inv_env[None, None, None, :]
    # TODO(synk): for large T / n_fft (e.g. n_fft>=512, hundreds of frames) this
    # dense matrix wastes FLOPs/VMEM on its zero band; tile the time axis with
    # an n_fft/hop halo instead (matters most on v7x's 64 MiB VMEM).
    return M.reshape(2 * T * F, L_pad).astype(np.float32)


def _istft_kernel(x_ref, m_ref, out_ref):
    # x_ref: (Bt, 2*T*F)   m_ref: (2*T*F, L_pad)   out_ref: (Bt, L_pad)
    out_ref[...] = jnp.dot(
        x_ref[...], m_ref[...],
        preferred_element_type=jnp.float32,
        precision=jax.lax.Precision.HIGHEST,   # see precision note at top
    ).astype(out_ref.dtype)


def _batch_tile(B):
    # sublane-friendly batch tile; tiny / odd batches fall back to a full block
    if B % 8 != 0:
        return B
    for bt in (512, 256, 128, 64, 32, 16, 8):
        if B % bt == 0:
            return bt
    return B


def istft_module_forward(x, *, n_fft, hop_length, win_length):
    """Pallas equivalent of iSTFT_module.forward.
    x: (B, 2, T, F) with F = n_fft//2 + 1; returns (B, L) time-domain samples."""
    B, two, T, F = x.shape
    assert two == 2 and F == n_fft // 2 + 1
    L = n_fft + hop_length * (T - 1)          # torch.istft length, center=False
    L_pad = ((L + 127) // 128) * 128          # lane-dense output
    K = 2 * T * F

    M = jnp.asarray(
        _fused_synthesis_matrix(n_fft, hop_length, win_length, T, L, L_pad))
    x_flat = x.reshape(B, K).astype(jnp.float32)   # free contiguous reshape

    Bt = _batch_tile(B)
    out = pl.pallas_call(
        _istft_kernel,
        out_shape=jax.ShapeDtypeStruct((B, L_pad), jnp.float32),
        grid_spec=pltpu.PrefetchScalarGridSpec(
            num_scalar_prefetch=0,
            grid=(B // Bt,),
            in_specs=[
                pl.BlockSpec((Bt, K), lambda b: (b, 0)),       # flattened spec
                pl.BlockSpec((K, L_pad), lambda b: (0, 0)),    # fused synthesis mat
            ],
            out_specs=pl.BlockSpec((Bt, L_pad), lambda b: (b, 0)),
        ),
        compiler_params=pltpu.CompilerParams(
            dimension_semantics=("parallel",)),
    )(x_flat, M)
    return out[:, :L]


def istft_reference(x, *, n_fft, hop_length, win_length):
    """Pure-JAX reference (same math as torch.istft with center=False)."""
    B, _, T, F = x.shape
    L = n_fft + hop_length * (T - 1)
    win = _hann_window(win_length)
    lpad = (n_fft - win_length) // 2
    w_pad = np.zeros((n_fft,), np.float64)
    w_pad[lpad:lpad + win_length] = win
    w_pad = jnp.asarray(w_pad.astype(np.float32))

    spec = x[:, 0].astype(jnp.float32) + 1j * x[:, 1].astype(jnp.float32)
    frames = jnp.fft.irfft(spec, n=n_fft, axis=-1).astype(jnp.float32) * w_pad

    y = jnp.zeros((B, L), jnp.float32)
    env = jnp.zeros((L,), jnp.float32)
    for t in range(T):
        s = t * hop_length
        y = y.at[:, s:s + n_fft].add(frames[:, t, :])
        env = env.at[s:s + n_fft].add(w_pad * w_pad)
    return jnp.where(env > 1e-11, y / env, 0.0)


if __name__ == "__main__":
    # Small shapes consistent with the module: n_fft=32 -> F=17 freq bins,
    # hop=8, win=32, T=8 frames, batch=2.  Output length L = 32 + 8*7 = 88.
    n_fft, hop_length, win_length = 32, 8, 32
    B, T = 2, 8
    F = n_fft // 2 + 1

    key = jax.random.PRNGKey(0)
    x = jax.random.normal(key, (B, 2, T, F), dtype=jnp.float32)

    y = istft_module_forward(x, n_fft=n_fft, hop_length=hop_length,
                             win_length=win_length)
    y = jax.block_until_ready(y)

    y_ref = istft_reference(x, n_fft=n_fft, hop_length=hop_length,
                            win_length=win_length)
    np.testing.assert_allclose(np.asarray(y), np.asarray(y_ref),
                               atol=2e-3, rtol=2e-3)
    print("KERNEL_OK")
</pallas_src>

<mosaic_0001>
module attributes {stable_mosaic.version = 11 : i64} {
  func.func @_istft_kernel(%arg0: i32, %arg1: memref<2x272xf32, #tpu.memory_space<vmem>>, %arg2: memref<272x128xf32, #tpu.memory_space<vmem>>, %arg3: memref<2x128xf32, #tpu.memory_space<vmem>>) attributes {dimension_semantics = [#tpu.dimension_semantics<parallel>], iteration_bounds = array<i64: 1>, scalar_prefetch = 0 : i64, scratch_operands = 0 : i64, tpu.core_type = #tpu.core_type<tc>, window_params = [{transform_indices = @transform_0, window_bounds = array<i64: 2, 272>}, {pipeline_mode = #tpu.pipeline_mode<synchronous>, transform_indices = @transform_1, window_bounds = array<i64: 272, 128>}, {transform_indices = @transform_2, window_bounds = array<i64: 2, 128>}]} {
    %c0 = arith.constant 0 : index
    %c0_0 = arith.constant 0 : index
    %0 = vector.load %arg1[%c0, %c0_0] : memref<2x272xf32, #tpu.memory_space<vmem>>, vector<2x272xf32>
    %c0_1 = arith.constant 0 : index
    %c0_2 = arith.constant 0 : index
    %1 = vector.load %arg2[%c0_1, %c0_2] : memref<272x128xf32, #tpu.memory_space<vmem>>, vector<272x128xf32>
    %cst = arith.constant dense<0.000000e+00> : vector<2x128xf32>
    %2 = tpu.matmul %0, %1, %cst {dimension_numbers = #tpu.dot_dimension_numbers<[1], [0], [0], [1], [0, 0, 1, 1], [], []>, precision = #tpu.contract_precision<fp32>} : vector<2x272xf32>, vector<272x128xf32>, vector<2x128xf32> -> vector<2x128xf32>
    %c0_3 = arith.constant 0 : index
    %c0_4 = arith.constant 0 : index
    %3 = vector.load %arg3[%c0_3, %c0_4] : memref<2x128xf32, #tpu.memory_space<vmem>>, vector<2x128xf32>
    tpu.vector_store %arg3[%c0_3, %c0_4], %2 {strides = array<i32>} : memref<2x128xf32, #tpu.memory_space<vmem>>, vector<2x128xf32>,
    return
  }
  func.func @transform_0(%arg0: i32) -> (i32, i32) {
    %c0_i32 = arith.constant 0 : i32
    %c0_i32_0 = arith.constant 0 : i32
    return %arg0, %c0_i32 : i32, i32
  }
  func.func @transform_1(%arg0: i32) -> (i32, i32) {
    %c0_i32 = arith.constant 0 : i32
    %c0_i32_0 = arith.constant 0 : i32
    %c0_i32_1 = arith.constant 0 : i32
    return %c0_i32, %c0_i32_0 : i32, i32
  }
  func.func @transform_2(%arg0: i32) -> (i32, i32) {
    %c0_i32 = arith.constant 0 : i32
    %c0_i32_0 = arith.constant 0 : i32
    return %arg0, %c0_i32 : i32, i32
  }
}

</mosaic_0001>

<bundles_post_ra>
// kernel: tpu_custom_call.1
= control target key start
LH: loop header
LB: loop body
LE: loop exit
PB: predicated region body
PF: predicated region fallthrough
CT: control target
= control target key end

     0   :  { %7 = vsyncpa [#allocation3], 0  ;;  %s2501_s0 = inlined_call_operand.hbm [shape: f32[2,272], index: 0, kind: input, shape index: {}]   ;;  %s2502_s1 = inlined_call_operand.hbm [shape: f32[272,128], index: 1, kind: input, shape index: {}]   ;;  %s2503_s2 = inlined_call_operand.hbm [shape: f32[2,128], index: 2, kind: output, shape index: {}]  }
   0x1   :  { %8 = vsyncpa [#allocation6], 0 }
   0x2   :  { %9 = vsyncpa [#allocation4], 0  ;;  %s2005_s9 = smov [#allocation2]   ;;  %s2006_s11 = smov [#allocation5]  }
   0x3   :  { %s16_s10 = sshll.u32 %s2005_s9, 4  ;;  %s25_s12 = sshll.u32 %s2006_s11, 4  ;;  %s17_s10 = int_to_ptr.vmem [resolvable:$true] %s16_s10  ;;  %s2029_s12 = int_to_ptr.vmem [resolvable:$true] %s25_s12 }
   0x4   :  { %s1933_s15 = scalar_lea.hbm %s2501_s0, 96 }
   0x5   :  { %p1934_p0 = scmp.ne.s32.totalorder %s2501_s0, %s1933_s15  ;;  %p1937_p1 = scmp.lt.u32.totalorder %s1933_s15, %s2501_s0 }
   0x7   :  { %p1939_p2 = pnand %p1937_p1, %p1934_p0 }
   0x9   :  { %1942 = shalt.err (!%p1939_p2)
}
   0xa   :  { %s1943_s20 = scalar_lea.vmem %s17_s10, 96  ;;  %p1948_p4 = scmp.lt.s32.totalorder %s17_s10, %s17_s10 }
   0xb   :  { %p1944_p3 = scmp.ne.s32.totalorder %s17_s10, %s1943_s20  ;;  %p1949_p5 = scmp.lt.s32.totalorder %s1943_s20, %s1943_s20 }
   0xd   :  { %p1950_p6 = por %p1949_p5, %p1948_p4 }
   0xf   :  { %p1951_p7 = pnand %p1950_p6, %p1944_p3 }
  0x11   :  { %1954 = shalt.err (!%p1951_p7)
}
  0x12   :  { %19 = dma.hbm_to_vmem [thread:$0]  %s2501_s0, 96, %s17_s10, [#allocation3]  }
  0x13   :  { %s1955_s25 = scalar_lea.hbm %s2502_s1, 4352 }
  0x14   :  { %p1956_p8 = scmp.ne.s32.totalorder %s2502_s1, %s1955_s25  ;;  %p1959_p9 = scmp.lt.u32.totalorder %s1955_s25, %s2502_s1 }
  0x16   :  { %p1961_p10 = pnand %p1959_p9, %p1956_p8 }
  0x18   :  { %1964 = shalt.err (!%p1961_p10)
}
  0x19   :  { %s1965_s30 = scalar_lea.vmem %s2029_s12, 4352  ;;  %p1970_p12 = scmp.lt.s32.totalorder %s2029_s12, %s2029_s12 }
  0x1a   :  { %p1966_p11 = scmp.ne.s32.totalorder %s2029_s12, %s1965_s30  ;;  %p1971_p13 = scmp.lt.s32.totalorder %s1965_s30, %s1965_s30 }
  0x1c   :  { %p1972_p0 = por %p1971_p13, %p1970_p12 }
  0x1e   :  { %p1973_p1 = pnand %p1972_p0, %p1966_p11 }
  0x20   :  { %1976 = shalt.err (!%p1973_p1)
}
  0x21   :  { %s2007_s0 = smov 128   ;;  %s2008_s3 = smov 8  }
  0x22   :  { %31 = dma.hbm_to_vmem [thread:$0]  %s2502_s1, 4352, %s2029_s12, [#allocation6], %s2007_s0, %s2007_s0, %s2008_s3  }
  0x23   :  { %1999 = dma.done.wait [#allocation3], 96  }
  0x24   :  { %2000 = vsyncadd [#allocation3], 4294967200 }
  0x25   :  { %2001 = dma.done.wait [#allocation6], 4352  }
  0x26   :  { %2002 = vsyncadd [#allocation6], 4294962944  ;;  %v78_v0 = vlaneseq  ;;  %v2009_v1 = vmov 1983009808   ;;  %v55_v3 = vld [vmem:[#allocation5 + $0x80] sm:$0xff]  ;;  %v56_v4 = vld [vmem:[#allocation5 + $0x88] sm:$0xff] }
  0x27   :  { %v76_v2 = vunpack.c.l.s4 %v2009_v1  ;;  %v39_v5 = vld [vmem:[#allocation5] sm:$0xff]  ;;  %v144_v7 = vand.u32 4294901760, %v55_v3  ;;  %v147_v8 = vand.u32 4294901760, %v56_v4  ;;  %v40_v9 = vld [vmem:[#allocation5 + $0x8] sm:$0xff]  ;;  %v57_v11 = vld [vmem:[#allocation5 + $0x90] sm:$0xff]  ;;  %vm92_vm0 = vcmask 130048  }
  0x28   :  { %v79_v6 = vshrl.u32 %v78_v0, 7  ;;  %v96_v10 = vand.u32 4294901760, %v39_v5  ;;  %v58_v12 = vld [vmem:[#allocation5 + $0x98] sm:$0xff]  ;;  %v99_v14 = vand.u32 4294901760, %v40_v9  ;;  %v150_v15 = vand.u32 4294901760, %v57_v11  ;;  %v41_v17 = vld [vmem:[#allocation5 + $0x10] sm:$0xff] }
  0x29   :  { %v77_v13 = vunpack.c.0.s8 %v76_v2  ;;  %v153_v16 = vand.u32 4294901760, %v58_v12  ;;  %v42_v18 = vld [vmem:[#allocation5 + $0x18] sm:$0xff]  ;;  %v2060_v19 = vpack.c.bf16 %v147_v8, %v144_v7  ;;  %v102_v21 = vand.u32 4294901760, %v41_v17  ;;  %v59_v23 = vld [vmem:[#allocation5 + $0xa0] sm:$0xff]  ;;  %v60_v24 = vld [vmem:[#allocation5 + $0xa8] sm:$0xff]  ;;  %s2013_s1 = smov [#allocation7]  }
  0x2a   :  { %v2062_v20 = vsub.f32 %v39_v5, %v96_v10  ;;  %v105_v22 = vand.u32 4294901760, %v42_v18  ;;  %v2064_v25 = vpack.c.bf16 %v99_v14, %v96_v10  ;;  %v2066_v26 = vsub.f32 %v40_v9, %v99_v14  ;;  %v43_v28 = vld [vmem:[#allocation5 + $0x20] sm:$0xff]  ;;  %v44_v29 = vld [vmem:[#allocation5 + $0x28] sm:$0xff]  ;;  %v61_v42 = vld [vmem:[#allocation5 + $0xb0] sm:$0xff]  ;;  %s1423_s6 = sshll.u32 %s2013_s1, 4  ;;  %s1424_s6 = int_to_ptr.vmem [resolvable:$true] %s1423_s6 }
  0x2b   :  { %v2068_v27 = vpack.c.bf16 %v153_v16, %v150_v15  ;;  %1704 = vmatprep.subr.bf16.mxu0 %v2060_v19  ;;  %v2071_v30 = vsub.f32 %v57_v11, %v150_v15  ;;  %v2073_v31 = vsub.f32 %v58_v12, %v153_v16  ;;  %v2077_v33 = vsub.s32 %v77_v13, %v79_v6  ;;  %v62_v47 = vld [vmem:[#allocation5 + $0xb8] sm:$0xff]  ;;  %v45_v60 = vld [vmem:[#allocation5 + $0x30] sm:$0xff]  ;;  %v63_v10 = vld [vmem:[#allocation5 + $0xc0] sm:$0xff]  ;;  %s1977_s7 = scalar_lea.vmem %s1424_s6, 32  ;;  %p1982_p3 = scmp.lt.s32.totalorder %s1424_s6, %s1424_s6 }
  0x2c   :  { %v2075_v32 = vpack.c.bf16 %v105_v22, %v102_v21  ;;  %1706 = vmatpush3.bf16.msra.mxu0 %v2064_v25  ;;  %v156_v34 = vand.u32 4294901760, %v59_v23  ;;  %v159_v35 = vand.u32 4294901760, %v60_v24  ;;  %v2080_v36 = vsub.f32 %v55_v3, %v144_v7  ;;  %v46_v61 = vld [vmem:[#allocation5 + $0x38] sm:$0xff]  ;;  %v64_v11 = vld [vmem:[#allocation5 + $0xc8] sm:$0xff]  ;;  %v47_v16 = vld [vmem:[#allocation5 + $0x40] sm:$0xff]  ;;  %p1978_p2 = scmp.ne.s32.totalorder %s1424_s6, %s1977_s7  ;;  %p1983_p4 = scmp.lt.s32.totalorder %s1977_s7, %s1977_s7 }
  0x2d   :  { %v2082_v37 = vsub.f32 %v56_v4, %v147_v8  ;;  %1708 = vmatprep.subr.bf16.mxu0 %v2068_v27  ;;  %v108_v38 = vand.u32 4294901760, %v43_v28  ;;  %v111_v39 = vand.u32 4294901760, %v44_v29  ;;  %v2518_v40 = vand.u32 4294901760, %v2062_v20 }
  0x2e   :  { %v2516_v41 = vand.u32 4294901760, %v2066_v26  ;;  %v2087_v43 = vsub.f32 %v41_v17, %v102_v21  ;;  %v2089_v44 = vsub.f32 %v42_v18, %v105_v22  ;;  %v2091_v45 = vpack.c.bf16 %v159_v35, %v156_v34  ;;  %p1984_p5 = por %p1983_p4, %p1982_p3 }
  0x2f   :  { %v2521_v46 = vand.u32 4294901760, %v2080_v36  ;;  %v2094_v48 = vsub.f32 %v59_v23, %v156_v34  ;;  %v2096_v49 = vsub.f32 %v60_v24, %v159_v35  ;;  %v2520_v50 = vand.u32 4294901760, %v2082_v37  ;;  %v48_v34 = vld [vmem:[#allocation5 + $0x48] sm:$0xff] }
  0x30   :  { %v2099_v51 = vpack.c.bf16 %v111_v39, %v108_v38  ;;  %1710 = vmatpush3.bf16.msra.mxu0 %v2075_v32  ;;  %v211_v53 = vsub.f32 %v2062_v20, %v2518_v40  ;;  %v218_v54 = vsub.f32 %v2066_v26, %v2516_v41  ;;  %v162_v55 = vand.u32 4294901760, %v61_v42  ;;  %v70_v41 = vld [vmem:[#allocation5 + $0xf8] sm:$0xff]  ;;  %p1985_p6 = pnand %p1984_p5, %p1978_p2 }
  0x31   :  { %v323_v52 = vsub.f32 %v2080_v36, %v2521_v46  ;;  %1712 = vmatprep.subr.bf16.mxu0 %v2091_v45  ;;  %v330_v56 = vsub.f32 %v2082_v37, %v2520_v50  ;;  %v165_v57 = vand.u32 4294901760, %v62_v47  ;;  %v2515_v58 = vand.u32 4294901760, %v2071_v30 }
  0x32   :  { %v2513_v59 = vand.u32 4294901760, %v2073_v31  ;;  %v2117_v63 = vsub.f32 %v43_v28, %v108_v38  ;;  %v212_v0 = vand.u32 4294901760, %v211_v53  ;;  %v219_v1 = vand.u32 4294901760, %v218_v54 }
  0x33   :  { %v324_v62 = vand.u32 4294901760, %v323_v52  ;;  %v331_v2 = vand.u32 4294901760, %v330_v56  ;;  %v2119_v3 = vsub.f32 %v44_v29, %v111_v39  ;;  %v2121_v4 = vpack.c.bf16 %v165_v57, %v162_v55 }
  0x34   :  { %v337_v5 = vsub.f32 %v2071_v30, %v2515_v58  ;;  %1714 = vmatpush3.bf16.msra.mxu0 %v2099_v51  ;;  %v1737_v6 = vpack.c.bf16 %v219_v1, %v212_v0  ;;  %v344_v7 = vsub.f32 %v2073_v31, %v2513_v59  ;;  %v114_v8 = vand.u32 4294901760, %v45_v60  ;;  %v65_v0 = vld [vmem:[#allocation5 + $0xd0] sm:$0xff]  ;;  %v66_v1 = vld [vmem:[#allocation5 + $0xd8] sm:$0xff] }
  0x35   :  { %v117_v9 = vand.u32 4294901760, %v46_v61  ;;  %v1735_v12 = vpack.c.bf16 %v331_v2, %v324_v62  ;;  %1716 = vmatprep.subr.bf16.mxu0 %v2121_v4  ;;  %v2511_v14 = vand.u32 4294901760, %v2087_v43  ;;  %v2510_v15 = vand.u32 4294901760, %v2089_v44  ;;  %v69_v58 = vld [vmem:[#allocation5 + $0xf0] sm:$0xff] }
  0x36   :  { %v338_v13 = vand.u32 4294901760, %v337_v5  ;;  %v2133_v17 = vsub.f32 %v61_v42, %v162_v55  ;;  %v2135_v18 = vsub.f32 %v62_v47, %v165_v57  ;;  %v345_v21 = vand.u32 4294901760, %v344_v7 }
  0x37   :  { %v2137_v22 = vpack.c.bf16 %v117_v9, %v114_v8  ;;  %1736 = vmatprep.subr.bf16.mxu1 %v1735_v12  ;;  %v225_v23 = vsub.f32 %v2087_v43, %v2511_v14  ;;  %v232_v24 = vsub.f32 %v2089_v44, %v2510_v15  ;;  %v168_v28 = vand.u32 4294901760, %v63_v10 }
  0x38   :  { %v171_v29 = vand.u32 4294901760, %v64_v11  ;;  %1738 = vmatpush3.bf16.msra.mxu1 %v1737_v6  ;;  %v1739_v35 = vpack.c.bf16 %v345_v21, %v338_v13  ;;  %v2508_v38 = vand.u32 4294901760, %v2094_v48  ;;  %v2506_v39 = vand.u32 4294901760, %v2096_v49  ;;  %v49_v6 = vld [vmem:[#allocation5 + $0x50] sm:$0xff] }
  0x39   :  { %1718 = vmatpush3.bf16.msra.mxu0 %v2137_v22  ;;  %v120_v42 = vand.u32 4294901760, %v47_v16  ;;  %v2148_v47 = vsub.f32 %v45_v60, %v114_v8  ;;  %v226_v52 = vand.u32 4294901760, %v225_v23  ;;  %v233_v53 = vand.u32 4294901760, %v232_v24  ;;  %v50_v24 = vld [vmem:[#allocation5 + $0x58] sm:$0xff] }
  0x3a   :  { %v2150_v54 = vpack.c.bf16 %v171_v29, %v168_v28  ;;  %1740 = vmatprep.subr.bf16.mxu1 %v1739_v35  ;;  %v2152_v55 = vsub.f32 %v46_v61, %v117_v9  ;;  %v351_v56 = vsub.f32 %v2094_v48, %v2508_v38  ;;  %v358_v57 = vsub.f32 %v2096_v49, %v2506_v39  ;;  %v68_v39 = vld [vmem:[#allocation5 + $0xe8] sm:$0xff] }
  0x3b   :  { %v123_v62 = vand.u32 4294901760, %v48_v34  ;;  %v1741_v60 = vpack.c.bf16 %v233_v53, %v226_v52  ;;  %v2161_v2 = vsub.f32 %v63_v10, %v168_v28  ;;  %v2505_v5 = vand.u32 4294901760, %v2117_v63 }
  0x3c   :  { %1720 = vmatprep.subr.bf16.mxu0 %v2150_v54  ;;  %v2504_v61 = vand.u32 4294901760, %v2119_v3  ;;  %v2165_v7 = vsub.f32 %v64_v11, %v171_v29  ;;  %v352_v8 = vand.u32 4294901760, %v351_v56  ;;  %v359_v9 = vand.u32 4294901760, %v358_v57 }
  0x3d   :  { %v2167_v12 = vpack.c.bf16 %v123_v62, %v120_v42  ;;  %1742 = vmatpush3.bf16.msra.mxu1 %v1741_v60  ;;  %v239_v13 = vsub.f32 %v2117_v63, %v2505_v5  ;;  %v174_v21 = vand.u32 4294901760, %v65_v0  ;;  %v177_v23 = vand.u32 4294901760, %v66_v1  ;;  %v67_v5 = vld [vmem:[#allocation5 + $0xe0] sm:$0xff] }
  0x3e   :  { %v246_v10 = vsub.f32 %v2119_v3, %v2504_v61  ;;  %v1743_v28 = vpack.c.bf16 %v359_v9, %v352_v8  ;;  %v2507_v11 = vand.u32 4294901760, %v2133_v17  ;;  %v2509_v29 = vand.u32 4294901760, %v2135_v18 }
  0x3f   :  { %2553 = vst [vmem:[#allocation11_spill] sm:$0xff] %v2167_v12  ;;  %1722 = vmatpush3.bf16.msra.mxu0 %v2167_v12  ;;  %v126_v35 = vand.u32 4294901760, %v49_v6  ;;  %v2178_v52 = vsub.f32 %v47_v16, %v120_v42  ;;  %v240_v53 = vand.u32 4294901760, %v239_v13  ;;  %v2180_v57 = vpack.c.bf16 %v177_v23, %v174_v21 }
  0x40   :  { %v247_v56 = vand.u32 4294901760, %v246_v10  ;;  %1744 = vmatprep.subr.bf16.mxu1 %v1743_v28  ;;  %v2182_v60 = vsub.f32 %v48_v34, %v123_v62  ;;  %v365_v8 = vsub.f32 %v2133_v17, %v2507_v11  ;;  %v372_v9 = vsub.f32 %v2135_v18, %v2509_v29  ;;  %v51_v62 = vld [vmem:[#allocation5 + $0x60] sm:$0xff]  ;;  %v52_v29 = vld [vmem:[#allocation5 + $0x68] sm:$0xff] }
  0x41   :  { %2554 = vst [vmem:[#allocation12_spill] sm:$0xff] %v2180_v57  ;;  %v129_v61 = vand.u32 4294901760, %v50_v24  ;;  %1724 = vmatprep.subr.bf16.mxu0 %v2180_v57  ;;  %v2191_v42 = vsub.f32 %v65_v0, %v174_v21  ;;  %v2512_v13 = vand.u32 4294901760, %v2148_v47  ;;  %v2514_v34 = vand.u32 4294901760, %v2152_v55 }
  0x42   :  { %v1745_v16 = vpack.c.bf16 %v247_v56, %v240_v53  ;;  %v2195_v10 = vsub.f32 %v66_v1, %v177_v23  ;;  %v366_v28 = vand.u32 4294901760, %v365_v8  ;;  %v373_v11 = vand.u32 4294901760, %v372_v9 }
  0x43   :  { %v2197_v38 = vpack.c.bf16 %v129_v61, %v126_v35  ;;  %v253_v53 = vsub.f32 %v2148_v47, %v2512_v13  ;;  %v260_v0 = vsub.f32 %v2152_v55, %v2514_v34  ;;  %v180_v21 = vand.u32 4294901760, %v67_v5 }
  0x44   :  { %1746 = vmatpush3.bf16.msra.mxu1 %v1745_v16  ;;  %v183_v56 = vand.u32 4294901760, %v68_v39  ;;  %v1747_v15 = vpack.c.bf16 %v373_v11, %v366_v28  ;;  %v2517_v1 = vand.u32 4294901760, %v2161_v2  ;;  %v2519_v23 = vand.u32 4294901760, %v2165_v7 }
  0x45   :  { %2555 = vst [vmem:[#allocation13_spill] sm:$0xff] %v2197_v38  ;;  %1726 = vmatpush3.bf16.msra.mxu0 %v2197_v38  ;;  %v132_v8 = vand.u32 4294901760, %v51_v62  ;;  %v2208_v9 = vsub.f32 %v49_v6, %v126_v35  ;;  %v254_v16 = vand.u32 4294901760, %v253_v53  ;;  %v261_v14 = vand.u32 4294901760, %v260_v0 }
  0x46   :  { %v2210_v13 = vpack.c.bf16 %v183_v56, %v180_v21  ;;  %1748 = vmatprep.subr.bf16.mxu1 %v1747_v15  ;;  %v2212_v59 = vsub.f32 %v50_v24, %v129_v61  ;;  %v379_v11 = vsub.f32 %v2161_v2, %v2517_v1  ;;  %v386_v28 = vsub.f32 %v2165_v7, %v2519_v23  ;;  %v53_v24 = vld [vmem:[#allocation5 + $0x70] sm:$0xff]  ;;  %v54_v23 = vld [vmem:[#allocation5 + $0x78] sm:$0xff] }
  0x47   :  { %v135_v34 = vand.u32 4294901760, %v52_v29  ;;  %v1749_v6 = vpack.c.bf16 %v261_v14, %v254_v16  ;;  %v2221_v35 = vsub.f32 %v67_v5, %v180_v21  ;;  %v2522_v15 = vand.u32 4294901760, %v2178_v52 }
  0x48   :  { %2556 = vst [vmem:[#allocation14_spill] sm:$0xff] %v2210_v13  ;;  %1728 = vmatprep.subr.bf16.mxu0 %v2210_v13  ;;  %v2525_v61 = vand.u32 4294901760, %v2182_v60  ;;  %v2225_v53 = vsub.f32 %v68_v39, %v183_v56  ;;  %v380_v0 = vand.u32 4294901760, %v379_v11  ;;  %v387_v1 = vand.u32 4294901760, %v386_v28 }
  0x49   :  { %v2227_v40 = vpack.c.bf16 %v135_v34, %v132_v8  ;;  %1750 = vmatpush3.bf16.msra.mxu1 %v1749_v6  ;;  %v267_v14 = vsub.f32 %v2178_v52, %v2522_v15  ;;  %v186_v21 = vand.u32 4294901760, %v69_v58  ;;  %v189_v16 = vand.u32 4294901760, %v70_v41 }
  0x4a   :  { %v274_v5 = vsub.f32 %v2182_v60, %v2525_v61  ;;  %v1751_v50 = vpack.c.bf16 %v387_v1, %v380_v0  ;;  %v2528_v39 = vand.u32 4294901760, %v2191_v42  ;;  %v2529_v56 = vand.u32 4294901760, %v2195_v10 }
  0x4b   :  { %2557 = vst [vmem:[#allocation15_spill] sm:$0xff] %v2227_v40  ;;  %1730 = vmatpush3.bf16.msra.mxu0 %v2227_v40  ;;  %v138_v11 = vand.u32 4294901760, %v53_v24  ;;  %v2238_v28 = vsub.f32 %v51_v62, %v132_v8  ;;  %v268_v6 = vand.u32 4294901760, %v267_v14  ;;  %v2240_v15 = vpack.c.bf16 %v189_v16, %v186_v21  ;;  %v2250_v40 = vld [vmem:[#allocation2] sm:$0x3f] }
  0x4c   :  { %v275_v46 = vand.u32 4294901760, %v274_v5  ;;  %1752 = vmatprep.subr.bf16.mxu1 %v1751_v50  ;;  %v2242_v13 = vsub.f32 %v52_v29, %v135_v34  ;;  %v393_v1 = vsub.f32 %v2191_v42, %v2528_v39  ;;  %v400_v0 = vsub.f32 %v2195_v10, %v2529_v56 }
  0x4d   :  { %2558 = vst [vmem:[#allocation16_spill] sm:$0xff] %v2240_v15  ;;  %v141_v61 = vand.u32 4294901760, %v54_v23  ;;  %1732 = vmatprep.subr.bf16.mxu0 %v2240_v15  ;;  %v2253_v8 = vsub.f32 %v69_v58, %v186_v21  ;;  %v2531_v50 = vand.u32 4294901760, %v2208_v9  ;;  %v2530_v29 = vand.u32 4294901760, %v2212_v59 }
  0x4e   :  { %v1753_v62 = vpack.c.bf16 %v275_v46, %v268_v6  ;;  %v2257_v34 = vsub.f32 %v70_v41, %v189_v16  ;;  %v394_v14 = vand.u32 4294901760, %v393_v1  ;;  %v401_v5 = vand.u32 4294901760, %v400_v0 }
  0x4f   :  { %2559 = vst [vmem:[#allocation17_spill] sm:$0xff] %v2253_v8  ;;  %v2259_v39 = vpack.c.bf16 %v141_v61, %v138_v11  ;;  %v2261_v56 = vsub.f32 %v53_v24, %v138_v11  ;;  %v281_v46 = vsub.f32 %v2208_v9, %v2531_v50  ;;  %v288_v58 = vsub.f32 %v2212_v59, %v2530_v29 }
  0x50   :  { %2560 = vst [vmem:[#allocation18_spill] sm:$0xff] %v2257_v34  ;;  %1754 = vmatpush3.bf16.msra.mxu1 %v1753_v62  ;;  %v81_v21 = vrot.slane %v2250_v40, %v2077_v33  ;;  %v1755_v41 = vpack.c.bf16 %v401_v5, %v394_v14  ;;  %v2538_v16 = vand.u32 4294901760, %v2221_v35  ;;  %v2541_v6 = vand.u32 4294901760, %v2225_v53 }
  0x51   :  { %2561 = vst [vmem:[#allocation19_spill] sm:$0xff] %v2259_v39  ;;  %1734 = vmatpush3.bf16.msra.mxu0 %v2259_v39  ;;  %v1767_v24 = vpack.c.bf16 %v2082_v37, %v2080_v36  ;;  %v282_v11 = vand.u32 4294901760, %v281_v46  ;;  %v289_v1 = vand.u32 4294901760, %v288_v58  ;;  %v2539_v5 = vand.u32 4294901760, %v2238_v28 }
  0x52   :  { %v89_v0 = vcombine.high %v81_v21, %v81_v21  ;;  %v2276_v62 = vand.u32 4294901760, %v81_v21  ;;  %1756 = vmatprep.subr.bf16.mxu1 %v1755_v41  ;;  %v407_v29 = vsub.f32 %v2221_v35, %v2538_v16  ;;  %v414_v14 = vsub.f32 %v2225_v53, %v2541_v6 }
  0x53   :  { %1768 = vmatprep.subr.bf16.mxu0 %v1767_v24  ;;  %v2540_v50 = vand.u32 4294901760, %v2242_v13  ;;  %v2286_v39 = vsub.f32 %v54_v23, %v141_v61  ;;  %v1757_v46 = vpack.c.bf16 %v289_v1, %v282_v11  ;;  %v295_v16 = vsub.f32 %v2238_v28, %v2539_v5 }
  0x54   :  { %v2288_v58 = vand.u32 4294901760, %v89_v0  ;;  %v2291_v41 = vsub.f32 %v81_v21, %v2276_v62  ;;  %v408_v15 = vand.u32 4294901760, %v407_v29  ;;  %v415_v38 = vand.u32 4294901760, %v414_v14 }
  0x55   :  { %v302_v24 = vsub.f32 %v2242_v13, %v2540_v50  ;;  %1758 = vmatpush3.bf16.msra.mxu1 %v1757_v46  ;;  %v420_v11 = vand.u32 4294901760, %v2253_v8  ;;  %v427_v21 = vand.u32 4294901760, %v2257_v34  ;;  %v296_v1 = vand.u32 4294901760, %v295_v16 }
  0x56   :  { %2562 = vst [vmem:[#allocation20_spill] sm:$0xff] %v2288_v58  ;;  %2563 = vst [vmem:[#allocation21_spill] sm:$0xff] %v2291_v41  ;;  %v2300_v23 = vsub.f32 %v89_v0, %v2288_v58  ;;  %v2548_v61 = vand.u32 4294901760, %v2291_v41  ;;  %432 = vmatprep.mubr.f32.mxu1 %v2288_v58  ;;  %v1759_v29 = vpack.c.bf16 %v415_v38, %v408_v15  ;;  %v308_v57 = vand.u32 4294901760, %v2261_v56 }
  0x57   :  { %v303_v14 = vand.u32 4294901760, %v302_v24  ;;  %v421_v0 = vsub.f32 %v2253_v8, %v420_v11  ;;  %v428_v50 = vsub.f32 %v2257_v34, %v427_v21  ;;  %v315_v12 = vand.u32 4294901760, %v2286_v39 }
  0x58   :  { %v193_v5 = vand.u32 4294901760, %v2300_v23  ;;  %v200_v46 = vsub.f32 %v2291_v41, %v2548_v61  ;;  %1760 = vmatprep.subr.bf16.mxu1 %v1759_v29  ;;  %v309_v58 = vsub.f32 %v2261_v56, %v308_v57  ;;  %v1769_v34 = vpack.c.bf16 %v2066_v26, %v2062_v20 }
  0x59   :  { %v1761_v6 = vpack.c.bf16 %v303_v14, %v296_v1  ;;  %v422_v15 = vand.u32 4294901760, %v421_v0  ;;  %v429_v16 = vand.u32 4294901760, %v428_v50  ;;  %v316_v61 = vsub.f32 %v2286_v39, %v315_v12 }
  0x5a   :  { %v194_v38 = vsub.f32 %v2300_v23, %v193_v5  ;;  %v201_v24 = vand.u32 4294901760, %v200_v46  ;;  %v1771_v1 = vpack.c.bf16 %v2073_v31, %v2071_v30  ;;  %v310_v14 = vand.u32 4294901760, %v309_v58 }
  0x5b   :  { %1762 = vmatpush3.bf16.msra.mxu1 %v1761_v6  ;;  %v1763_v29 = vpack.c.bf16 %v429_v16, %v422_v15  ;;  %v317_v8 = vand.u32 4294901760, %v316_v61  ;;  %v74_v50 = vcombine.high %v2250_v40, %v2250_v40  ;;  %v1773_v46 = vpack.c.bf16 %v2089_v44, %v2087_v43 }
  0x5c   :  { %v195_v41 = vand.u32 4294901760, %v194_v38  ;;  %v1775_v0 = vpack.c.bf16 %v2096_v49, %v2094_v48  ;;  %v2564_v38 = vand.u32 4294901760, %v2080_v36  ;;  %v2565_v58 = vand.u32 4294901760, %v2082_v37 }
  0x5d   :  { %1764 = vmatprep.subr.bf16.mxu1 %v1763_v29  ;;  %v1765_v6 = vpack.c.bf16 %v317_v8, %v310_v14  ;;  %v2566_v61 = vand.u32 4294901760, %v2062_v20  ;;  %v2567_v40 = vand.u32 4294901760, %v2066_v26  ;;  %v2568_v8 = vand.u32 4294901760, %v2071_v30 }
  0x5e   :  { %196 = vmatprep.mubr.f32.mxu0 %v195_v41  ;;  %v1831_v41 = vpack.c.bf16 %v2565_v58, %v2564_v38  ;;  %v2569_v16 = vand.u32 4294901760, %v2073_v31  ;;  %v2572_v37 = vand.u32 4294901760, %v2094_v48  ;;  %v2573_v29 = vand.u32 4294901760, %v2096_v49 }
  0x5f   :  { %202 = vmatmul.mubr.f32.vlgmr.msra.gmra.mrb[0].mxu0 %v201_v24  ;;  %v1833_v15 = vpack.c.bf16 %v2567_v40, %v2566_v61  ;;  %1766 = vmatpush3.bf16.msra.mxu1 %v1765_v6  ;;  %v2574_v26 = vand.u32 4294901760, %v2117_v63  ;;  %v2575_v14 = vand.u32 4294901760, %v2119_v3  ;;  %v2576_v31 = vand.u32 4294901760, %v2133_v17 }
  0x60   :  { %1770 = vmatpush3.bf16.msra.mxu0 %v1769_v34  ;;  %569 = vmatprep.mubr.f32.mxu0 %v2300_v23  ;;  %v1835_v24 = vpack.c.bf16 %v2569_v16, %v2568_v8  ;;  %v2570_v34 = vand.u32 4294901760, %v2087_v43  ;;  %v2571_v23 = vand.u32 4294901760, %v2089_v44  ;;  %v1839_v20 = vpack.c.bf16 %v2573_v29, %v2572_v37 }
  0x61   :  { %1772 = vmatprep.subr.bf16.mxu0 %v1771_v1  ;;  %v2352_v30 = vpack.c.bf16 %v2575_v14, %v2574_v26  ;;  %1800 = vmatprep.subr.bf16.mxu1 %v2060_v19  ;;  %v2577_v43 = vand.u32 4294901760, %v2135_v18  ;;  %v2578_v44 = vand.u32 4294901760, %v2148_v47  ;;  %v2579_v48 = vand.u32 4294901760, %v2152_v55 }
  0x62   :  { %v1837_v36 = vpack.c.bf16 %v2571_v23, %v2570_v34  ;;  %v2580_v6 = vand.u32 4294901760, %v2161_v2  ;;  %v2581_v38 = vand.u32 4294901760, %v2165_v7  ;;  %v2582_v61 = vand.u32 4294901760, %v2178_v52  ;;  %434 = vmatmul.mubr.f32.vlgmr.msra.gmra.mrb[0].mxu1 %v2276_v62 }
  0x63   :  { %v2359_v1 = vpack.c.bf16 %v2577_v43, %v2576_v31  ;;  %v2365_v49 = vpack.c.bf16 %v2579_v48, %v2578_v44  ;;  %v2583_v40 = vand.u32 4294901760, %v2182_v60  ;;  %v2584_v16 = vand.u32 4294901760, %v2191_v42  ;;  %1802 = vmatpush3.bf16.msra.mxu1 %v2064_v25  ;;  %676 = vmatprep.mubr.f32.mxu1 %v193_v5 }
  0x64   :  { %v2371_v58 = vpack.c.bf16 %v2581_v38, %v2580_v6  ;;  %v2585_v34 = vand.u32 4294901760, %v2195_v10  ;;  %v2586_v37 = vand.u32 4294901760, %v2208_v9  ;;  %v2587_v29 = vand.u32 4294901760, %v2212_v59  ;;  %1774 = vmatpush3.bf16.msra.mxu0 %v1773_v46  ;;  %1804 = vmatprep.subr.bf16.mxu1 %v2068_v27 }
  0x65   :  { %v2377_v8 = vpack.c.bf16 %v2583_v40, %v2582_v61  ;;  %v2588_v14 = vand.u32 4294901760, %v2221_v35  ;;  %v2589_v31 = vand.u32 4294901760, %v2225_v53  ;;  %v2590_v44 = vand.u32 4294901760, %v2238_v28  ;;  %1776 = vmatprep.subr.bf16.mxu0 %v1775_v0 }
  0x66   :  { %v2383_v23 = vpack.c.bf16 %v2585_v34, %v2584_v16  ;;  %v2389_v26 = vpack.c.bf16 %v2587_v29, %v2586_v37  ;;  %v2591_v48 = vand.u32 4294901760, %v2242_v13  ;;  %v1777_v38 = vpack.c.bf16 %v2119_v3, %v2117_v63 }
  0x67   :  { %v2395_v43 = vpack.c.bf16 %v2589_v31, %v2588_v14  ;;  %v2406_v61 = vpack.c.bf16 %v427_v21, %v420_v11  ;;  %v2408_v40 = vpack.c.bf16 %v315_v12, %v308_v57  ;;  %v1779_v16 = vpack.c.bf16 %v2135_v18, %v2133_v17  ;;  %1806 = vmatpush3.bf16.msra.mxu1 %v2075_v32  ;;  %v2594_v12 = vld [vmem:[#allocation18_spill] sm:$0xff]  ;;  %v2595_v57 = vld [vmem:[#allocation12_spill] sm:$0xff] }
  0x68   :  { %v2401_v6 = vpack.c.bf16 %v2591_v48, %v2590_v44  ;;  %v2414_v34 = vrot.slane %v74_v50, %v2077_v33  ;;  %1778 = vmatpush3.bf16.msra.mxu0 %v1777_v38  ;;  %v1781_v63 = vpack.c.bf16 %v2152_v55, %v2148_v47  ;;  %v1783_v3 = vpack.c.bf16 %v2165_v7, %v2161_v2  ;;  %v2592_v2 = vld [vmem:[#allocation11_spill] sm:$0xff]  ;;  %v2593_v7 = vld [vmem:[#allocation17_spill] sm:$0xff] }
  0x69   :  { %1780 = vmatprep.subr.bf16.mxu0 %v1779_v16  ;;  %1808 = vmatprep.subr.bf16.mxu1 %v2091_v45  ;;  %v1785_v33 = vpack.c.bf16 %v2182_v60, %v2178_v52  ;;  %v1787_v17 = vpack.c.bf16 %v2195_v10, %v2191_v42  ;;  %v1789_v18 = vpack.c.bf16 %v2212_v59, %v2208_v9  ;;  %v2596_v60 = vld [vmem:[#allocation13_spill] sm:$0xff]  ;;  %v2597_v42 = vld [vmem:[#allocation14_spill] sm:$0xff]  ;;  %v2599_v10 = vld [vmem:[#allocation16_spill] sm:$0xff]  ;;  %v2010_v11 = vmov 0.0|0.0  }
  0x6a   :  { %v1791_v47 = vpack.c.bf16 %v2225_v53, %v2221_v35  ;;  %v1793_v55 = vpack.c.bf16 %v2242_v13, %v2238_v28  ;;  %v1795_v52 = vpack.c.bf16 %v2594_v12, %v2593_v7  ;;  %v1797_v59 = vpack.c.bf16 %v2286_v39, %v2261_v56  ;;  %v2598_v13 = vld [vmem:[#allocation15_spill] sm:$0xff]  ;;  %v2600_v9 = vld [vmem:[#allocation21_spill] sm:$0xff]  ;;  %v2601_v35 = vld [vmem:[#allocation20_spill] sm:$0xff] }
  0x6b   :  { %1810 = vmatpush3.bf16.msra.mxu1 %v2099_v51  ;;  %v2602_v53 = vld [vmem:[#allocation19_spill] sm:$0xff]  ;;  %v2603_v39 = vand.u32 4294901760, %v2600_v9  ;;  %vm2011_vm1 = vmmov 0   ;;  %v2012_v0 = vmov 0.0  }
  0x6c   :  { %1782 = vmatpush3.bf16.msra.mxu0 %v1781_v63  ;;  %1812 = vmatprep.subr.bf16.mxu1 %v2121_v4 }
  0x6d   :  { %1784 = vmatprep.subr.bf16.mxu0 %v1783_v3 }
  0x6f   :  { %1814 = vmatpush3.bf16.msra.mxu1 %v2137_v22 }
  0x70   :  { %1786 = vmatpush3.bf16.msra.mxu0 %v1785_v33  ;;  %1816 = vmatprep.subr.bf16.mxu1 %v2150_v54 }
  0x71   :  { %1788 = vmatprep.subr.bf16.mxu0 %v1787_v17 }
  0x73   :  { %1818 = vmatpush3.bf16.msra.mxu1 %v2592_v2 }
  0x74   :  { %1790 = vmatpush3.bf16.msra.mxu0 %v1789_v18  ;;  %1820 = vmatprep.subr.bf16.mxu1 %v2595_v57 }
  0x75   :  { %1792 = vmatprep.subr.bf16.mxu0 %v1791_v47 }
  0x77   :  { %1822 = vmatpush3.bf16.msra.mxu1 %v2596_v60 }
  0x78   :  { %1794 = vmatpush3.bf16.msra.mxu0 %v1793_v55  ;;  %1824 = vmatprep.subr.bf16.mxu1 %v2597_v42 }
  0x79   :  { %1796 = vmatprep.subr.bf16.mxu0 %v1795_v52 }
  0x7b   :  { %1826 = vmatpush3.bf16.msra.mxu1 %v2598_v13 }
  0x7c   :  { %1798 = vmatpush3.bf16.msra.mxu0 %v1797_v59  ;;  %1828 = vmatprep.subr.bf16.mxu1 %v2599_v10 }
  0x7d   :  { %1832 = vmatprep.subr.bf16.mxu0 %v1831_v41 }
  0x7f   :  { %572 = vmatmul.mubr.f32.vlgmr.msra.gmra.mrb[2].mxu0 %v2600_v9  ;;  %1830 = vmatpush3.bf16.msra.mxu1 %v2602_v53 }
  0x80   :  { %1834 = vmatpush3.bf16.msra.mxu0 %v1833_v15  ;;  %846 = vmatprep.mubr.f32.mxu0 %v2601_v35 }
  0x81   :  { %1836 = vmatprep.subr.bf16.mxu0 %v1835_v24  ;;  %1864 = vmatprep.subr.bf16.mxu1 %v2060_v19  ;;  %v71_v19 = vld [vmem:[#allocation5 + $0x100] sm:$0xff] }
  0x82   :  { %680 = vmatmul.mubr.f32.vlgmr.msra.gmra.mrb[2].mxu1 %v2603_v39 }
  0x83   :  { %1866 = vmatpush3.bf16.msra.mxu1 %v2064_v25  ;;  %950 = vmatprep.mubr.f32.mxu1 %v2601_v35  ;;  %v72_v25 = vld [vmem:[#allocation5 + $0x108] sm:$0xff] }
  0x84   :  { %1838 = vmatpush3.bf16.msra.mxu0 %v1837_v36  ;;  %1868 = vmatprep.subr.bf16.mxu1 %v2068_v27  ;;  %v93_v27 = vsel %vm92_vm0, %v2414_v34, 0 }
  0x85   :  { %1840 = vmatprep.subr.bf16.mxu0 %v1839_v20 }
  0x87   :  { %1870 = vmatpush3.bf16.msra.mxu1 %v2075_v32  ;;  %v958_v32 = vand.u32 4294901760, %v71_v19 }
  0x88   :  { %1842 = vmatpush3.bf16.msra.mxu0 %v2352_v30  ;;  %1872 = vmatprep.subr.bf16.mxu1 %v2091_v45  ;;  %v961_v45 = vand.u32 4294901760, %v72_v25 }
  0x89   :  { %1844 = vmatprep.subr.bf16.mxu0 %v2359_v1 }
  0x8a   :  { %v1043_v56 = vsub.f32 %v72_v25, %v961_v45  ;;  %v1896_v5 = vpack.c.bf16 %v961_v45, %v958_v32 }
  0x8b   :  { %1874 = vmatpush3.bf16.msra.mxu1 %v2099_v51  ;;  %v1024_v51 = vand.u32 4294901760, %v93_v27 }
  0x8c   :  { %1846 = vmatpush3.bf16.msra.mxu0 %v2365_v49  ;;  %1876 = vmatprep.subr.bf16.mxu1 %v2121_v4  ;;  %v1036_v4 = vsub.f32 %v71_v19, %v958_v32  ;;  %v1044_v28 = vand.u32 4294901760, %v1043_v56 }
  0x8d   :  { %1848 = vmatprep.subr.bf16.mxu0 %v2371_v58 }
  0x8e   :  { %v1045_v50 = vsub.f32 %v1043_v56, %v1044_v28 }
  0x8f   :  { %1878 = vmatpush3.bf16.msra.mxu1 %v2137_v22  ;;  %v1025_v22 = vsub.f32 %v93_v27, %v1024_v51 }
  0x90   :  { %1850 = vmatpush3.bf16.msra.mxu0 %v2377_v8  ;;  %1880 = vmatprep.subr.bf16.mxu1 %v2150_v54  ;;  %v1037_v54 = vand.u32 4294901760, %v1036_v4  ;;  %v1046_v36 = vand.u32 4294901760, %v1045_v50 }
  0x91   :  { %1852 = vmatprep.subr.bf16.mxu0 %v2383_v23  ;;  %v1026_v46 = vand.u32 4294901760, %v1025_v22 }
  0x92   :  { %v1038_v21 = vsub.f32 %v1036_v4, %v1037_v54  ;;  %v1908_v41 = vpack.c.bf16 %v1044_v28, %v1037_v54 }
  0x93   :  { %1882 = vmatpush3.bf16.msra.mxu1 %v2592_v2  ;;  %v1027_v15 = vsub.f32 %v1025_v22, %v1026_v46 }
  0x94   :  { %1854 = vmatpush3.bf16.msra.mxu0 %v2389_v26  ;;  %1884 = vmatprep.subr.bf16.mxu1 %v2595_v57  ;;  %v1039_v24 = vand.u32 4294901760, %v1038_v21 }
  0x95   :  { %1856 = vmatprep.subr.bf16.mxu0 %v2395_v43  ;;  %v1028_v20 = vand.u32 4294901760, %v1027_v15 }
  0x96   :  { %v1899_v30 = vpack.c.bf16 %v1046_v36, %v1039_v24 }
  0x97   :  { %1886 = vmatpush3.bf16.msra.mxu1 %v2596_v60 }
  0x98   :  { %1858 = vmatpush3.bf16.msra.mxu0 %v2401_v6  ;;  %1888 = vmatprep.subr.bf16.mxu1 %v2597_v42 }
  0x99   :  { %1860 = vmatprep.subr.bf16.mxu0 %v2406_v61 }
  0x9b   :  { %1890 = vmatpush3.bf16.msra.mxu1 %v2598_v13 }
  0x9c   :  { %1862 = vmatpush3.bf16.msra.mxu0 %v2408_v40  ;;  %1892 = vmatprep.subr.bf16.mxu1 %v2599_v10 }
  0x9d   :  { %1904 = vmatprep.subr.bf16.mxu0 %v2010_v11 }
  0x9f   :  { %848 = vmatmul.mubr.f32.vlgmr.msra.gmra.mrb[4].mxu0 %v2276_v62  ;;  %1894 = vmatpush3.bf16.msra.mxu1 %v2602_v53 }
  0xa0   :  { %1906 = vmatpush3.bf16.msra.mxu0 %v1896_v5  ;;  %1686 = vmatprep.mubr.msk.f32.mxu0 %vm2011_vm1, %v2012_v0 }
  0xa1   :  { %1907 = vmatprep.subr.bf16.mxu0 %v2010_v11  ;;  %1895 = vmatprep.subr.bf16.mxu1 %v2010_v11 }
  0xa2   :  { %952 = vmatmul.mubr.f32.vlgmr.msra.gmra.mrb[4].mxu1 %v2276_v62  ;;  %v1902_v62 = vpack.c.bf16 %v1043_v56, %v1036_v4 }
  0xa3   :  { %1687 = vmatmul.mubr.f32.vlgmr.msra.gmra.mrb[6].mxu0 %v1026_v46  ;;  %1897 = vmatpush3.bf16.msra.mxu1 %v1896_v5 }
  0xa4   :  { %1909 = vmatpush3.bf16.msra.mxu0 %v1908_v41  ;;  %1665 = vmatprep.mubr.msk.f32.mxu1 %vm2011_vm1, %v2012_v0 }
  0xa5   :  { %1693 = vmatprep.mubr.msk.f32.mxu0 %vm2011_vm1, %v2012_v0  ;;  %1898 = vmatprep.subr.bf16.mxu1 %v2010_v11 }
  0xa6   :  { %1910 = vmatprep.subr.bf16.mxu0 %v2010_v11  ;;  %1666 = vmatmul.mubr.f32.vlgmr.msra.gmra.mrb[6].mxu1 %v1028_v20 }
  0xa7   :  { %1900 = vmatpush3.bf16.msra.mxu1 %v1899_v30  ;;  %1672 = vmatprep.mubr.msk.f32.mxu1 %vm2011_vm1, %v2012_v0 }
  0xa8   :  { %1901 = vmatprep.subr.bf16.mxu1 %v2010_v11 }
  0xab   :  { %1694 = vmatmul.mubr.f32.vlgmr.msra.gmra.mrb[6].mxu0 %v1024_v51 }
  0xac   :  { %1912 = vmatpush3.bf16.msra.mxu0 %v1896_v5  ;;  %1700 = vmatprep.mubr.msk.f32.mxu0 %vm2011_vm1, %v2012_v0 }
  0xae   :  { %1673 = vmatmul.mubr.f32.vlgmr.msra.gmra.mrb[6].mxu1 %v1024_v51 }
  0xaf   :  { %1903 = vmatpush3.bf16.msra.mxu1 %v1902_v62  ;;  %1679 = vmatprep.mubr.msk.f32.mxu1 %vm2011_vm1, %v2012_v0 }
  0xb3   :  { %1701 = vmatmul.mubr.f32.vlgmr.msra.gmra.mrb[6].mxu0 %v1024_v51 }
  0xb6   :  { %1680 = vmatmul.mubr.f32.vlgmr.msra.gmra.mrb[6].mxu1 %v1025_v22 }
 0x132   :  { %v1465_v1 = vpop.f32.mrb[0].mxu0 }
 0x133   :  { %v1466_v49 = vpop.f32.mrb[1].mxu0 }
 0x134   :  { %v1467_v58 = vadd.f32 %v1466_v49, %v1465_v1 }
 0x135   :  { %v1500_v8 = vpop.f32.mrb[0].mxu1 }
 0x136   :  { %v1501_v23 = vpop.f32.mrb[1].mxu1 }
 0x137   :  { %v1502_v37 = vadd.f32 %v1501_v23, %v1500_v8 }
 0x139   :  { %v436_v29 = vadd.f32 %v1502_v37, %v1467_v58 }
 0x152   :  { %v1535_v26 = vpop.f32.mrb[2].mxu0 }
 0x153   :  { %v1536_v14 = vpop.f32.mrb[3].mxu0 }
 0x154   :  { %v1537_v31 = vadd.f32 %v1536_v14, %v1535_v26 }
 0x155   :  { %v1570_v44 = vpop.f32.mrb[2].mxu1 }
 0x156   :  { %v574_v43 = vadd.f32 %v1537_v31, %v436_v29  ;;  %v1571_v48 = vpop.f32.mrb[3].mxu1 }
 0x157   :  { %v1572_v6 = vadd.f32 %v1571_v48, %v1570_v44 }
 0x159   :  { %v682_v38 = vadd.f32 %v1572_v6, %v574_v43 }
 0x172   :  { %v1605_v61 = vpop.f32.mrb[4].mxu0 }
 0x173   :  { %v1606_v40 = vpop.f32.mrb[5].mxu0 }
 0x174   :  { %v1607_v16 = vadd.f32 %v1606_v40, %v1605_v61 }
 0x175   :  { %v1640_v63 = vpop.f32.mrb[4].mxu1 }
 0x176   :  { %v850_v34 = vadd.f32 %v1607_v16, %v682_v38  ;;  %v1641_v3 = vpop.f32.mrb[5].mxu1 }
 0x177   :  { %v1642_v33 = vadd.f32 %v1641_v3, %v1640_v63 }
 0x179   :  { %v954_v17 = vadd.f32 %v1642_v33, %v850_v34 }
 0x186   :  { %v1412_v18 = vpop.f32.mrb[6].mxu0 }
 0x187   :  { %v1702_v47 = vpop.f32.mrb[7].mxu0 }
 0x189   :  { %v1187_v55 = vpop.f32.mrb[6].mxu1 }
 0x18a   :  { %v1913_v2 = vadd.f32 %v1187_v55, %v954_v17  ;;  %v1681_v7 = vpop.f32.mrb[7].mxu1 }
 0x18c   :  { %v1914_v12 = vadd.f32 %v1913_v2, %v1412_v18 }
 0x18e   :  { %1416 = vst [vmem:[#allocation7] sm:$0x3] %v1914_v12 }
 0x18f   :  { %1988 = shalt.err (!%p1985_p6)
}
 0x190   :  { %s1989_s10 = scalar_lea.hbm %s2503_s2, 32 }
 0x191   :  { %p1990_p7 = scmp.ne.s32.totalorder %s2503_s2, %s1989_s10  ;;  %p1993_p8 = scmp.lt.u32.totalorder %s1989_s10, %s2503_s2 }
 0x193   :  { %p1995_p9 = pnand %p1993_p8, %p1990_p7 }
 0x195   :  { %1998 = shalt.err (!%p1995_p9)
}
 0x196   :  { %1426 = dma.vmem_to_hbm [thread:$0]  %s1424_s6, 32, %s2503_s2, [#allocation4]  }
 0x197   :  { %2003 = dma.done.wait [#allocation4], 32  }
 0x198   :  { %2004 = vsyncadd [#allocation4], 4294967264 }
 0x199   :  { %1430 = vsyncpa [#allocation3], 1 }
 0x19a   :  { %1431 = vsyncpa [#allocation6], 1 }
 0x19b   :  { %1432 = vsyncpa [#allocation4], 1 }

</bundles_post_ra>
